<compile_context>
chip_gen: v7x
topology: tpu7x:2x2x1
jax: 0.10.0
libtpu: 0.0.40
codegen_flags: <defaults>
</compile_context>

<pallas_src>
import functools

import jax
import jax.numpy as jnp
from jax import lax
from jax.experimental import pallas as pl
from jax.experimental.pallas import tpu as pltpu


def _round_up(x, m):
    return (x + m - 1) // m * m


# ----------------------------------------------------------------------------
# exact-erf GELU from exp / VPU primitives (lowers on all TPU generations)
# ----------------------------------------------------------------------------
def _erf(x):
    # Abramowitz & Stegun 7.1.26, |abs err| <= 1.5e-7; one EUP exp + VPU ops.
    p = 0.3275911
    a1, a2, a3, a4, a5 = (0.254829592, -0.284496736, 1.421413741,
                          -1.453152027, 1.061405429)
    ax = jnp.abs(x)
    t = 1.0 / (1.0 + p * ax)
    poly = ((((a5 * t + a4) * t + a3) * t + a2) * t + a1) * t
    y = 1.0 - poly * jnp.exp(-ax * ax)
    return jnp.where(x < 0.0, -y, y)


def _gelu_erf(x):
    # PyTorch nn.GELU() default: 0.5 * x * (1 + erf(x / sqrt(2)))
    return 0.5 * x * (1.0 + _erf(x * 0.7071067811865476))


# ----------------------------------------------------------------------------
# Fused kernel: trunc layer-1 (VPU broadcast MACs) + erf-GELU + folded
# (trunc layer-2 * branch * field) matmul.  One (batch item, N-tile) per
# grid point.
# ----------------------------------------------------------------------------
def _fused_predictor_kernel(coords_ref, w1_ref, b1_ref, wc_ref, bc_ref, o_ref,
                            *, coord_dim, use_bf16):
    x = coords_ref[0]                                   # (tile_n, coord_dim)

    # trunc layer 1: K = coord_dim (tiny) -> VPU broadcast MACs, not the MXU.
    h = b1_ref[...] + x[:, 0:1] * w1_ref[0:1, :]        # (tile_n, hidden)
    for c in range(1, coord_dim):
        h = h + x[:, c:c + 1] * w1_ref[c:c + 1, :]
    h = _gelu_erf(h)                                    # exact-erf GELU (f32)

    # folded trunc-layer-2 * branch * field-net matmul (MXU, f32 accumulate)
    wc = wc_ref[0]                                      # (hidden, field_dim)
    if use_bf16:
        h = h.astype(jnp.bfloat16)
        wc = wc.astype(jnp.bfloat16)
    out = jnp.dot(h, wc, preferred_element_type=jnp.float32)
    out = out + bc_ref[0]                               # (tile_n, field_dim)
    o_ref[0] = out.astype(o_ref.dtype)                  # unpadded field_dim


def fused_predict(coords, w1, b1, wc, bc, *, tile_n=1024, use_bf16=True):
    """coords:(B,N,C) w1:(C,H) b1:(1,H) wc:(B,H,Fd) bc:(B,1,Fd) -> (B,Np,Fd)."""
    batch, n, coord_dim = coords.shape
    hidden = w1.shape[1]
    field_dim = wc.shape[2]

    tile_n = max(8, min(tile_n, _round_up(n, 8)))       # multiple of 8 sublanes
    if batch == 1:
        # keep >= 2 N-tiles so both v7x TensorCores get work (v5e/v6e: 1 TC)
        tile_n = min(tile_n, max(8, _round_up(-(-n // 2), 8)))
    n_pad = _round_up(n, tile_n)
    if n_pad != n:
        coords = jnp.pad(coords, ((0, 0), (0, n_pad - n), (0, 0)))

    grid = (batch, n_pad // tile_n)

    flops = 2 * batch * n_pad * (coord_dim * hidden + hidden * field_dim)
    bytes_accessed = 4 * (batch * n_pad * coord_dim            # coords in
                          + batch * hidden * (field_dim + 1)   # Wc / bc
                          + hidden * (coord_dim + 1)           # w1 / b1
                          + batch * n_pad * field_dim)         # output (unpadded)

    kernel = functools.partial(_fused_predictor_kernel,
                               coord_dim=coord_dim, use_bf16=use_bf16)
    return pl.pallas_call(
        kernel,
        out_shape=jax.ShapeDtypeStruct((batch, n_pad, field_dim), jnp.float32),
        grid=grid,
        in_specs=[
            # streamed coords tile (lane-padded in VMEM; fine at tile_n<=2048)
            pl.BlockSpec((1, tile_n, coord_dim), lambda b, i: (b, i, 0)),
            # shared trunc layer-1 weights: constant index map -> VMEM-resident
            pl.BlockSpec((coord_dim, hidden), lambda b, i: (0, 0)),
            pl.BlockSpec((1, hidden), lambda b, i: (0, 0)),
            # per-batch folded weights: fetched once per batch item
            pl.BlockSpec((1, hidden, field_dim), lambda b, i: (b, 0, 0)),
            pl.BlockSpec((1, 1, field_dim), lambda b, i: (b, 0, 0)),
        ],
        # full (unpadded) field_dim as the last block dim: legal per the
        # (8,128)-or-full-dim rule; avoids 16x padded output HBM writes.
        out_specs=pl.BlockSpec((1, tile_n, field_dim), lambda b, i: (b, i, 0)),
        compiler_params=pltpu.CompilerParams(
            dimension_semantics=("parallel", "parallel"),
            vmem_limit_bytes=32 * 1024 * 1024,          # v7x-safe working set
        ),
        cost_estimate=pl.CostEstimate(
            flops=int(flops),
            transcendentals=int(batch * n_pad * hidden),
            bytes_accessed=int(bytes_accessed),
        ),
    )(coords, w1, b1, wc, bc)


# ----------------------------------------------------------------------------
# predictor forward: branch net + algebraic fold in plain JAX, hot path fused
# ----------------------------------------------------------------------------
def predictor_forward(params, design, coords, *, tile_n=1024, use_bf16=True):
    _, n, _ = coords.shape
    hi = lax.Precision.HIGHEST

    # branch net: (batch, design_dim) -> (batch, H). Negligible work -> plain
    # JAX (no kernel launch / HBM roundtrip worth a pallas_call).
    y = jax.nn.gelu(jnp.dot(design, params["branch_w1"], precision=hi)
                    + params["branch_b1"], approximate=False)
    bvec = jnp.dot(y, params["branch_w2"], precision=hi) + params["branch_b2"]

    # exact reassociation:  ((h @ W2 + b2) * bvec) @ Wf + bf == h @ Wc + bc
    w2, b2 = params["trunc_w2"], params["trunc_b2"]
    wf, bf = params["field_w"], params["field_b"]
    wc = jnp.einsum("jk,bk,kf->bjf", w2, bvec, wf, precision=hi)   # (B, H, Fd)
    bc = (jnp.dot(b2[None, :] * bvec, wf, precision=hi)
          + bf[None, :])[:, None, :]                               # (B, 1, Fd)

    out = fused_predict(coords, params["trunc_w1"],
                        params["trunc_b1"][None, :], wc, bc,
                        tile_n=tile_n, use_bf16=use_bf16)
    return out[:, :n, :]    # row trim only (no lane slice; output is unpadded)


# ----------------------------------------------------------------------------
# Deterministic parameter init
# ----------------------------------------------------------------------------
def init_params(key, coord_dim, design_dim, hidden, field_dim):
    keys = jax.random.split(key, 10)
    s = 0.1

    def lin(kw, kb, din, dout):
        w = jax.random.normal(kw, (din, dout), jnp.float32) * s
        b = jax.random.normal(kb, (dout,), jnp.float32) * s
        return w, b

    p = {}
    p["trunc_w1"], p["trunc_b1"] = lin(keys[0], keys[1], coord_dim, hidden)
    p["trunc_w2"], p["trunc_b2"] = lin(keys[2], keys[3], hidden, hidden)
    p["branch_w1"], p["branch_b1"] = lin(keys[4], keys[5], design_dim, hidden)
    p["branch_w2"], p["branch_b2"] = lin(keys[6], keys[7], hidden, hidden)
    p["field_w"], p["field_b"] = lin(keys[8], keys[9], hidden, field_dim)
    return p


# ----------------------------------------------------------------------------
# Reference (pure jnp, PyTorch semantics: exact-erf GELU, f32 math)
# ----------------------------------------------------------------------------
def reference_forward(params, design, coords):
    hi = lax.Precision.HIGHEST
    T = jax.nn.gelu(jnp.matmul(coords, params["trunc_w1"], precision=hi)
                    + params["trunc_b1"], approximate=False)
    T = jnp.matmul(T, params["trunc_w2"], precision=hi) + params["trunc_b2"]
    B = jax.nn.gelu(jnp.matmul(design, params["branch_w1"], precision=hi)
                    + params["branch_b1"], approximate=False)
    B = jnp.matmul(B, params["branch_w2"], precision=hi) + params["branch_b2"]
    B = jnp.tile(B[:, None, :], (1, T.shape[1], 1))     # torch.tile equivalent
    feature = B * T
    return jnp.matmul(feature, params["field_w"], precision=hi) + params["field_b"]


if __name__ == "__main__":
    key = jax.random.PRNGKey(0)
    k_design, k_coords, k_params = jax.random.split(key, 3)

    batch = 2
    N = 16            # number of spatial points (flattened)
    coord_dim = 2     # 2D rotor coordinates
    design_dim = 4    # design-variable vector length
    hidden = 32       # branch.planes[-1]
    field_dim = 8     # output field channels

    design = jax.random.normal(k_design, (batch, design_dim), jnp.float32)
    coords = jax.random.normal(k_coords, (batch, N, coord_dim), jnp.float32)
    params = init_params(k_params, coord_dim, design_dim, hidden, field_dim)

    fwd = jax.jit(predictor_forward)
    out = jax.block_until_ready(fwd(params, design, coords))

    ref = reference_forward(params, design, coords)
    assert out.shape == (batch, N, field_dim)
    assert jnp.allclose(out, ref, atol=1e-4, rtol=1e-4)

    print("KERNEL_OK")
</pallas_src>

<mosaic_0001>
module attributes {stable_mosaic.version = 11 : i64} {
  func.func @_fused_predictor_kernel(%arg0: i32, %arg1: i32, %arg2: memref<1x16x2xf32, #tpu.memory_space<vmem>>, %arg3: memref<2x32xf32, #tpu.memory_space<vmem>>, %arg4: memref<1x32xf32, #tpu.memory_space<vmem>>, %arg5: memref<1x32x8xf32, #tpu.memory_space<vmem>>, %arg6: memref<1x1x8xf32, #tpu.memory_space<vmem>>, %arg7: memref<1x16x8xf32, #tpu.memory_space<vmem>>) attributes {dimension_semantics = [#tpu.dimension_semantics<parallel>, #tpu.dimension_semantics<parallel>], iteration_bounds = array<i64: 2, 1>, scalar_prefetch = 0 : i64, scratch_operands = 0 : i64, tpu.core_type = #tpu.core_type<tc>, window_params = [{transform_indices = @transform_0, window_bounds = array<i64: 1, 16, 2>}, {pipeline_mode = #tpu.pipeline_mode<synchronous>, transform_indices = @transform_1, window_bounds = array<i64: 2, 32>}, {pipeline_mode = #tpu.pipeline_mode<synchronous>, transform_indices = @transform_2, window_bounds = array<i64: 1, 32>}, {transform_indices = @transform_3, window_bounds = array<i64: 1, 32, 8>}, {transform_indices = @transform_4, window_bounds = array<i64: 1, 1, 8>}, {transform_indices = @transform_5, window_bounds = array<i64: 1, 16, 8>}]} {
    %c0 = arith.constant 0 : index
    %c0_0 = arith.constant 0 : index
    %c0_1 = arith.constant 0 : index
    %0 = vector.load %arg2[%c0, %c0_0, %c0_1] : memref<1x16x2xf32, #tpu.memory_space<vmem>>, vector<1x16x2xf32>
    %1 = vector.shape_cast %0 : vector<1x16x2xf32> to vector<16x2xf32>
    %c0_2 = arith.constant 0 : index
    %c0_3 = arith.constant 0 : index
    %2 = vector.load %arg4[%c0_2, %c0_3] : memref<1x32xf32, #tpu.memory_space<vmem>>, vector<1x32xf32>
    %3 = vector.extract_strided_slice %1 {offsets = [0, 0], sizes = [16, 1], strides = [1, 1]} : vector<16x2xf32> to vector<16x1xf32>
    %c0_4 = arith.constant 0 : index
    %c0_5 = arith.constant 0 : index
    %4 = vector.load %arg3[%c0_4, %c0_5] : memref<2x32xf32, #tpu.memory_space<vmem>>, vector<1x32xf32>
    %5 = vector.broadcast %3 : vector<16x1xf32> to vector<16x32xf32>
    %6 = vector.broadcast %4 : vector<1x32xf32> to vector<16x32xf32>
    %7 = arith.mulf %5, %6 : vector<16x32xf32>
    %8 = vector.broadcast %2 : vector<1x32xf32> to vector<16x32xf32>
    %9 = arith.addf %8, %7 : vector<16x32xf32>
    %10 = vector.extract_strided_slice %1 {offsets = [0, 1], sizes = [16, 1], strides = [1, 1]} : vector<16x2xf32> to vector<16x1xf32>
    %c1 = arith.constant 1 : index
    %c0_6 = arith.constant 0 : index
    %11 = vector.load %arg3[%c1, %c0_6] : memref<2x32xf32, #tpu.memory_space<vmem>>, vector<1x32xf32>
    %12 = vector.broadcast %10 : vector<16x1xf32> to vector<16x32xf32>
    %13 = vector.broadcast %11 : vector<1x32xf32> to vector<16x32xf32>
    %14 = arith.mulf %12, %13 : vector<16x32xf32>
    %15 = arith.addf %9, %14 : vector<16x32xf32>
    %cst = arith.constant 5.000000e-01 : f32
    %16 = vector.broadcast %cst : f32 to vector<16x32xf32>
    %17 = arith.mulf %16, %15 : vector<16x32xf32>
    %cst_7 = arith.constant 0.707106769 : f32
    %18 = vector.broadcast %cst_7 : f32 to vector<16x32xf32>
    %19 = arith.mulf %15, %18 : vector<16x32xf32>
    %20 = math.absf %19 : vector<16x32xf32>
    %cst_8 = arith.constant 0.327591091 : f32
    %21 = vector.broadcast %cst_8 : f32 to vector<16x32xf32>
    %22 = arith.mulf %21, %20 : vector<16x32xf32>
    %cst_9 = arith.constant 1.000000e+00 : f32
    %23 = vector.broadcast %cst_9 : f32 to vector<16x32xf32>
    %24 = arith.addf %23, %22 : vector<16x32xf32>
    %cst_10 = arith.constant 1.000000e+00 : f32
    %25 = vector.broadcast %cst_10 : f32 to vector<16x32xf32>
    %26 = arith.divf %25, %24 : vector<16x32xf32>
    %cst_11 = arith.constant 1.06140542 : f32
    %27 = vector.broadcast %cst_11 : f32 to vector<16x32xf32>
    %28 = arith.mulf %27, %26 : vector<16x32xf32>
    %cst_12 = arith.constant -1.45315206 : f32
    %29 = vector.broadcast %cst_12 : f32 to vector<16x32xf32>
    %30 = arith.addf %28, %29 : vector<16x32xf32>
    %31 = arith.mulf %30, %26 : vector<16x32xf32>
    %cst_13 = arith.constant 1.42141378 : f32
    %32 = vector.broadcast %cst_13 : f32 to vector<16x32xf32>
    %33 = arith.addf %31, %32 : vector<16x32xf32>
    %34 = arith.mulf %33, %26 : vector<16x32xf32>
    %cst_14 = arith.constant -0.284496725 : f32
    %35 = vector.broadcast %cst_14 : f32 to vector<16x32xf32>
    %36 = arith.addf %34, %35 : vector<16x32xf32>
    %37 = arith.mulf %36, %26 : vector<16x32xf32>
    %cst_15 = arith.constant 0.254829586 : f32
    %38 = vector.broadcast %cst_15 : f32 to vector<16x32xf32>
    %39 = arith.addf %37, %38 : vector<16x32xf32>
    %40 = arith.mulf %39, %26 : vector<16x32xf32>
    %cst_16 = arith.constant 0.000000e+00 : f32
    %41 = vector.broadcast %cst_16 : f32 to vector<16x32xf32>
    %42 = arith.subf %41, %20 : vector<16x32xf32>
    %43 = arith.mulf %42, %20 : vector<16x32xf32>
    %44 = math.exp %43 : vector<16x32xf32>
    %45 = arith.mulf %40, %44 : vector<16x32xf32>
    %cst_17 = arith.constant 1.000000e+00 : f32
    %46 = vector.broadcast %cst_17 : f32 to vector<16x32xf32>
    %47 = arith.subf %46, %45 : vector<16x32xf32>
    %cst_18 = arith.constant 0.000000e+00 : f32
    %48 = vector.broadcast %cst_18 : f32 to vector<16x32xf32>
    %49 = arith.cmpf olt, %19, %48 : vector<16x32xf32>
    %cst_19 = arith.constant 0.000000e+00 : f32
    %50 = vector.broadcast %cst_19 : f32 to vector<16x32xf32>
    %51 = arith.subf %50, %47 : vector<16x32xf32>
    %52 = arith.select %49, %51, %47 : vector<16x32xi1>, vector<16x32xf32>
    %cst_20 = arith.constant 1.000000e+00 : f32
    %53 = vector.broadcast %cst_20 : f32 to vector<16x32xf32>
    %54 = arith.addf %53, %52 : vector<16x32xf32>
    %55 = arith.mulf %17, %54 : vector<16x32xf32>
    %c0_21 = arith.constant 0 : index
    %c0_22 = arith.constant 0 : index
    %c0_23 = arith.constant 0 : index
    %56 = vector.load %arg5[%c0_21, %c0_22, %c0_23] : memref<1x32x8xf32, #tpu.memory_space<vmem>>, vector<1x32x8xf32>
    %57 = vector.shape_cast %56 : vector<1x32x8xf32> to vector<32x8xf32>
    %58 = arith.truncf %55 : vector<16x32xf32> to vector<16x32xbf16>
    %59 = arith.truncf %57 : vector<32x8xf32> to vector<32x8xbf16>
    %cst_24 = arith.constant dense<0.000000e+00> : vector<16x8xf32>
    %60 = tpu.matmul %58, %59, %cst_24 {dimension_numbers = #tpu.dot_dimension_numbers<[1], [0], [0], [1], [0, 0, 1, 1], [], []>} : vector<16x32xbf16>, vector<32x8xbf16>, vector<16x8xf32> -> vector<16x8xf32>
    %c0_25 = arith.constant 0 : index
    %c0_26 = arith.constant 0 : index
    %c0_27 = arith.constant 0 : index
    %61 = vector.load %arg6[%c0_25, %c0_26, %c0_27] : memref<1x1x8xf32, #tpu.memory_space<vmem>>, vector<1x1x8xf32>
    %62 = vector.shape_cast %61 : vector<1x1x8xf32> to vector<1x8xf32>
    %63 = vector.broadcast %62 : vector<1x8xf32> to vector<16x8xf32>
    %64 = arith.addf %60, %63 : vector<16x8xf32>
    %c0_28 = arith.constant 0 : index
    %c0_29 = arith.constant 0 : index
    %c0_30 = arith.constant 0 : index
    %65 = vector.load %arg7[%c0_28, %c0_29, %c0_30] : memref<1x16x8xf32, #tpu.memory_space<vmem>>, vector<1x16x8xf32>
    %66 = vector.shape_cast %65 : vector<1x16x8xf32> to vector<16x8xf32>
    %67 = vector.shape_cast %64 : vector<16x8xf32> to vector<1x16x8xf32>
    tpu.vector_store %arg7[%c0_28, %c0_29, %c0_30], %67 {strides = array<i32>} : memref<1x16x8xf32, #tpu.memory_space<vmem>>, vector<1x16x8xf32>,
    return
  }
  func.func @transform_0(%arg0: i32, %arg1: i32) -> (i32, i32, i32) {
    %c0_i32 = arith.constant 0 : i32
    %c0_i32_0 = arith.constant 0 : i32
    return %arg0, %arg1, %c0_i32 : i32, i32, i32
  }
  func.func @transform_1(%arg0: i32, %arg1: i32) -> (i32, i32) {
    %c0_i32 = arith.constant 0 : i32
    %c0_i32_0 = arith.constant 0 : i32
    %c0_i32_1 = arith.constant 0 : i32
    return %c0_i32, %c0_i32_0 : i32, i32
  }
  func.func @transform_2(%arg0: i32, %arg1: i32) -> (i32, i32) {
    %c0_i32 = arith.constant 0 : i32
    %c0_i32_0 = arith.constant 0 : i32
    %c0_i32_1 = arith.constant 0 : i32
    return %c0_i32, %c0_i32_0 : i32, i32
  }
  func.func @transform_3(%arg0: i32, %arg1: i32) -> (i32, i32, i32) {
    %c0_i32 = arith.constant 0 : i32
    %c0_i32_0 = arith.constant 0 : i32
    %c0_i32_1 = arith.constant 0 : i32
    return %arg0, %c0_i32, %c0_i32_0 : i32, i32, i32
  }
  func.func @transform_4(%arg0: i32, %arg1: i32) -> (i32, i32, i32) {
    %c0_i32 = arith.constant 0 : i32
    %c0_i32_0 = arith.constant 0 : i32
    %c0_i32_1 = arith.constant 0 : i32
    return %arg0, %c0_i32, %c0_i32_0 : i32, i32, i32
  }
  func.func @transform_5(%arg0: i32, %arg1: i32) -> (i32, i32, i32) {
    %c0_i32 = arith.constant 0 : i32
    %c0_i32_0 = arith.constant 0 : i32
    return %arg0, %arg1, %c0_i32 : i32, i32, i32
  }
}

</mosaic_0001>

<bundles_post_ra>
// kernel: predictor_forward.1
= control target key start
LH: loop header
LB: loop body
LE: loop exit
PB: predicated region body
PF: predicated region fallthrough
CT: control target
= control target key end

     0   :  { %s697_s18 = smov 0   ;;  %s699_s19 = smov 0   ;;  %s754_s0 = inlined_call_operand.vmem [shape: f32[2,16,2], index: 0, kind: input, shape index: {}]   ;;  %s755_s1 = inlined_call_operand.vmem [shape: f32[2,32], index: 1, kind: input, shape index: {}]   ;;  %s756_s2 = inlined_call_operand.vmem [shape: f32[1,32], index: 2, kind: input, shape index: {}]   ;;  %s757_s3 = inlined_call_operand.vmem [shape: f32[2,32,8], index: 3, kind: input, shape index: {}]   ;;  %s758_s4 = inlined_call_operand.vmem [shape: f32[2,1,8], index: 4, kind: input, shape index: {}]   ;;  %s759_s5 = inlined_call_operand.vmem [shape: f32[2,16,8], index: 5, kind: output, shape index: {}]  }
   0x1   :  { %s701_s20 = smov 0  }
   0x2 LB: > { %s27_s21 = sadd.s32 1, %s657_s19  ;;  %p572_p0 = scmp.ge.s32.totalorder %s661_s20, 1  ;;  %s661_s20 = sphi %s701_s20, %s15_s20   ;;  %s657_s19 = sphi %s699_s19, %s761_s19   ;;  %s653_s18 = sphi %s697_s18, %s760_s18  }
   0x3   : > { %p29_p1 = scmp.ge.s32.totalorder %s27_s21, 2  ;;  %p226_p2 = scmp.lt.s32.totalorder %s661_s20, 3 }
   0x5   : > { %s763_s21 = smov (%p29_p1, %s27_s21), 0  ;;  %p227_p3 = pnand %p572_p0, %p226_p2 }
   0x6   : > { %p271_p4 = scmp.lt.s32.totalorder (!%p227_p3), %s653_s18, 1  ;;  %v663_v0 = vmov (!%p227_p3), 1   ;;  %v664_v1 = vmov (!%p227_p3), 0   ;;  %v665_v7 = vmov (!%p227_p3), 0.0   ;;  %vm666_vm0 = vmmov (!%p227_p3), 0  }
   0x7   : > { %230 = sbr.rel (%p227_p3) target bundleno = 423 (0x1a7), region = 40  ;;  %629 = vset.pattern.permute.xlu1 (!%p227_p3), %v663_v0  ;;  %628 = vset.pattern.permute.xlu0 (!%p227_p3), %v664_v1  ;;  %v581_v11 = vld [vmem:[%s755_s1 + $0x1] ss:$0 sm:$0xff] (!%p227_p3)  ;;  %v579_v12 = vld [vmem:[%s755_s1] ss:$0 sm:$0xff] (!%p227_p3)  ;;  %vm412_vm3 = vcmask (!%p227_p3), 261120  }
   0x8   : > { %592 = vmatprep.subr.bf16.mxu0 (!%p227_p3), %v665_v7  ;;  %596 = vmatprep.mubr.msk.bf16.mxu0 (!%p227_p3), %vm666_vm0, %v665_v7  ;;  %v580_v14 = vld [vmem:[%s756_s2] ss:$0 sm:$0xff] (!%p227_p3)  ;;  %vm457_vm4 = vcmask (!%p227_p3), 64512  }
   0xe   : > { %s765_s18 = smov (!%p271_p4, %s653_s18), 1 }
   0xf   : > { %s586_s22 = sshll.u32 %s765_s18, 4  ;;  %s587_s26 = sshll.u32 %s765_s18, 5 }
  0x10   : > { %s278_s25 = scalar_lea.vmem %s754_s0, %s586_s22  ;;  %s284_s29 = scalar_lea.vmem %s757_s3, %s587_s26 }
  0x11   : > { %v299_v2 = vld [vmem:[%s278_s25] sm:$0xff]  ;;  %v300_v3 = vld [vmem:[%s278_s25 + $0x8] sm:$0xff]  ;;  %v400_v8 = vld [vmem:[%s284_s29 + $0x10] sm:$0xff]  ;;  %s287_s13 = scalar_lea.vmem %s758_s4, %s765_s18  ;;  %s296_s16 = scalar_lea.vmem %s759_s5, %s586_s22 }
  0x12   : > { %329 = vperm.xlu1 %629, %v299_v2   ;;  %305 = vperm.xlu0 %628, %v299_v2   ;;  %v398_v4 = vld [vmem:[%s284_s29] sm:$0xff]  ;;  %v399_v5 = vld [vmem:[%s284_s29 + $0x8] sm:$0xff]  ;;  %v401_v9 = vld [vmem:[%s284_s29 + $0x18] sm:$0xff] }
  0x13   : > { %v403_v6 = vpack.c.bf16 %v399_v5, %v398_v4  ;;  %v404_v10 = vpack.c.bf16 %v401_v9, %v400_v8 }
  0x15   : > { %593 = vmatpush3.bf16.msra.mxu0 %v403_v6 }
  0x16   : > { %333 = vperm.xlu1 %629, %v300_v3   ;;  %310 = vperm.xlu0 %628, %v300_v3  }
  0x17   : > { %594 = vmatprep.subr.bf16.mxu0 %v665_v7 }
  0x19   : > { %595 = vmatpush3.bf16.msra.mxu0 %v404_v10 }
  0x1a   : > { %630 = vset.pattern.permute.xlu0 %v663_v0 }
  0x91   : > { %v330_v13 = vpop.permute.xlu1 %329  ;;  %v306_v15 = vpop.permute.xlu0 %305 }
  0x92   : > { %v340_v16 = vmul.f32 %v581_v11, %v330_v13  ;;  %v317_v17 = vmul.f32 %v579_v12, %v306_v15  ;;  %v582_v13 = vld [vmem:[%s287_s13] ss:$0 sm:$0xff] }
  0x94   : > { %v325_v18 = vadd.f32 %v580_v14, %v317_v17 }
  0x95   : > { %v334_v19 = vpop.permute.xlu1 %333  ;;  %v311_v20 = vpop.permute.xlu0 %310 }
  0x96   : > { %v342_v21 = vadd.f32 %v340_v16, %v325_v18  ;;  %v318_v22 = vmul.f32 %v579_v12, %v311_v20  ;;  %v341_v24 = vmul.f32 %v581_v11, %v334_v19 }
  0x98   : > { %v346_v23 = vmul.f32 0.70710677, %v342_v21  ;;  %v326_v25 = vadd.f32 %v580_v14, %v318_v22  ;;  %v344_v7 = vmul.f32 0.5, %v342_v21 }
  0x9a   : > { %v348_v26 = vand.u32 2147483647, %v346_v23  ;;  %v343_v27 = vadd.f32 %v341_v24, %v326_v25  ;;  %vm388_vm1 = vcmp.lt.f32.partialorder %v346_v23, 0.0 }
  0x9c   : > { %v350_v28 = vmul.f32 0.3275911, %v348_v26  ;;  %v347_v29 = vmul.f32 0.70710677, %v343_v27  ;;  %v376_v34 = vsub.f32 0.0, %v348_v26  ;;  %v345_v8 = vmul.f32 0.5, %v343_v27 }
  0x9e   : > { %v352_v30 = vadd.f32 1.0, %v350_v28  ;;  %v349_v31 = vand.u32 2147483647, %v347_v29  ;;  %v378_v36 = vmul.f32 %v376_v34, %v348_v26  ;;  %vm389_vm2 = vcmp.lt.f32.partialorder %v347_v29, 0.0 }
  0xa0   : > { %631 = vrcp.f32 %v352_v30  ;;  %v351_v32 = vmul.f32 0.3275911, %v349_v31  ;;  %v377_v37 = vsub.f32 0.0, %v349_v31  ;;  %v380_v41 = vmul.f32 1.442695, %v378_v36 }
  0xa2   : > { %v353_v33 = vadd.f32 1.0, %v351_v32  ;;  %v379_v42 = vmul.f32 %v377_v37, %v349_v31 }
  0xa4   : > { %633 = vrcp.f32 %v353_v33  ;;  %v382_v47 = vmul.f32 1.442695, %v379_v42 }
  0xa5   : > { %635 = vpow2.f32 %v380_v41 }
  0xa6   : > { %637 = vpow2.f32 %v382_v47 }
  0xaa   : > { %v632_v35 = vpop.eup %631 }
  0xab   : > { %v358_v38 = vmul.f32 1.0614054, %v632_v35 }
  0xad   : > { %v360_v39 = vadd.f32 -1.4531521, %v358_v38 }
  0xae   : > { %v634_v40 = vpop.eup %633 }
  0xaf   : > { %v362_v43 = vmul.f32 %v632_v35, %v360_v39  ;;  %v359_v44 = vmul.f32 1.0614054, %v634_v40  ;;  %v636_v58 = vpop.eup %635 }
  0xb0   : > { %v638_v63 = vpop.eup %637 }
  0xb1   : > { %v364_v45 = vadd.f32 1.4214138, %v362_v43  ;;  %v361_v46 = vadd.f32 -1.4531521, %v359_v44 }
  0xb3   : > { %v366_v48 = vmul.f32 %v632_v35, %v364_v45  ;;  %v363_v49 = vmul.f32 %v634_v40, %v361_v46 }
  0xb5   : > { %v368_v50 = vadd.f32 -0.28449672, %v366_v48  ;;  %v365_v51 = vadd.f32 1.4214138, %v363_v49 }
  0xb7   : > { %v370_v52 = vmul.f32 %v632_v35, %v368_v50  ;;  %v367_v53 = vmul.f32 %v634_v40, %v365_v51 }
  0xb9   : > { %v372_v54 = vadd.f32 0.2548296, %v370_v52  ;;  %v369_v55 = vadd.f32 -0.28449672, %v367_v53 }
  0xbb   : > { %v374_v56 = vmul.f32 %v632_v35, %v372_v54  ;;  %v371_v57 = vmul.f32 %v634_v40, %v369_v55 }
  0xbd   : > { %v384_v59 = vmul.f32 %v636_v58, %v374_v56  ;;  %v373_v60 = vadd.f32 0.2548296, %v371_v57 }
  0xbf   : > { %v386_v61 = vsub.f32 1.0, %v384_v59  ;;  %v375_v62 = vmul.f32 %v634_v40, %v373_v60 }
  0xc1   : > { %v390_v0 = vsub.f32 0.0, %v386_v61  ;;  %v385_v1 = vmul.f32 %v638_v63, %v375_v62 }
  0xc3   : > { %v392_v2 = vsel %vm388_vm1, %v390_v0, %v386_v61  ;;  %v387_v3 = vsub.f32 1.0, %v385_v1 }
  0xc4   : > { %v394_v5 = vadd.f32 1.0, %v392_v2 }
  0xc5   : > { %v391_v4 = vsub.f32 0.0, %v387_v3 }
  0xc6   : > { %v396_v10 = vmul.f32 %v394_v5, %v344_v7 }
  0xc7   : > { %v393_v6 = vsel %vm389_vm2, %v391_v4, %v387_v3 }
  0xc8   : > { %v395_v9 = vadd.f32 1.0, %v393_v6 }
  0xca   : > { %v397_v11 = vmul.f32 %v395_v9, %v345_v8 }
  0xcc   : > { %v402_v12 = vpack.c.bf16 %v397_v11, %v396_v10 }
  0xce   : > { %597 = vmatmul.mubr.msk.bf16.vlgmr.msra.gmra.mrb[0].mxu0 %vm412_vm3, %v402_v12 }
 0x1a1   : > { %v450_v14 = vpop.f32.mrb[0].mxu0 }
 0x1a2   : > { %v451_v15 = vadd.f32 %v582_v13, %v450_v14  ;;  %v598_v16 = vpop.f32.mrb[1].mxu0 }
 0x1a3   : > { %v453_v17 = vpop.f32.mrb[2].mxu0 }
 0x1a4   : > { %458 = vst.msk [vmem:[%s296_s16] sm:$0xff] %vm457_vm4, %v451_v15  ;;  %v454_v18 = vadd.f32 %v582_v13, %v453_v17  ;;  %v599_v19 = vpop.f32.mrb[3].mxu0 }
 0x1a6   : > { %459 = vst.msk [vmem:[%s296_s16 + $0x8] sm:$0xff] %vm457_vm4, %v454_v18 }
 0x1a7 PF: > { %s15_s20 = sadd.s32 1, %s661_s20   ;;  %s760_s18 = smov %s657_s19 }
 0x1a8   : > { %p12_p5 = scmp.ge.s32.totalorder %s15_s20, 4   ;;  %s761_s19 = smov %s763_s21 }
 0x1aa   :  { %14 = sbr.rel (!%p12_p5) target bundleno = 2 (0x2), region = 76 }

</bundles_post_ra>
